<compile_context>
chip_gen: v6e
topology: v6e:2x2x1
jax: 0.10.0
libtpu: 0.0.40
codegen_flags: <defaults>
</compile_context>

<pallas_src>
import numpy as np

import jax
import jax.numpy as jnp
from jax.experimental import pallas as pl
from jax.experimental.pallas import tpu as pltpu


LANE = 128  # lane width used for the (zero-padded) pyramid pixel vectors


# ----------------------------------------------------------------------------
# Pallas kernel: the whole APN forward (all batch elements) in one invocation
# ----------------------------------------------------------------------------
def _apn_kernel(xl_ref, xr_ref, wmb_ref, bmid_ref, bb1_ref,
                a1_ref, a2c1_ref, a3ac2_ref, a3b_ref, ms_ref, pyb_ref, o_ref):
    f32, bf16 = jnp.float32, jnp.bfloat16
    Xl = xl_ref[...]                      # (Cin, B*HW)  bf16, pixels on lanes
    Xr = xr_ref[...]                      # (B, Cin*HW)  bf16, batch on sublanes
    pyb = pyb_ref[...]                    # (8, 2*lane)  f32 broadcast biases

    B = Xr.shape[0]
    Cout = bmid_ref.shape[0]
    lane = a3b_ref.shape[0]
    HW = o_ref.shape[-1]

    # ---- mid + branch1 share one K=Cin matmul (wmid stacked over wb1) -----
    T = jnp.dot(wmb_ref[...], Xl, preferred_element_type=f32)   # (2*Cout, B*HW)
    mid = jnp.maximum(T[:Cout, :] + bmid_ref[...], 0.0)         # (Cout, B*HW)
    tb1 = T[Cout:, :]                                           # (Cout, B*HW)

    # ---- pyramid: batch on sublanes (M=B), pixels on 128 lanes ------------
    # down1: channel contraction folded into one K = Cin*HW matmul.
    x1 = jnp.maximum(jnp.dot(Xr, a1_ref[...], preferred_element_type=f32)
                     + pyb[0:1, :lane], 0.0)                    # (B, lane)
    # down2 | conv1 fused along N (256 lanes wide).
    t2 = jnp.maximum(jnp.dot(x1.astype(bf16), a2c1_ref[...],
                             preferred_element_type=f32) + pyb[1:2, :], 0.0)
    x2, x1c = t2[:, :lane], t2[:, lane:]
    # down3[0] | conv2 fused along N (256 lanes wide).
    t3 = jnp.maximum(jnp.dot(x2.astype(bf16), a3ac2_ref[...],
                             preferred_element_type=f32) + pyb[2:3, :], 0.0)
    x3, x2c = t3[:, :lane], t3[:, lane:]
    # down3[1]
    x3 = jnp.maximum(jnp.dot(x3.astype(bf16), a3b_ref[...],
                             preferred_element_type=f32) + pyb[3:4, :lane], 0.0)
    # Fused upsample/add chain: one (B, 3*lane) @ (3*lane, HW) matmul.
    cat = jnp.concatenate([x2c, x3, x1c], axis=1).astype(bf16)  # (B, 3*lane)
    s = jnp.dot(cat, ms_ref[...], preferred_element_type=f32)   # (B, HW)

    # ---- epilogue per batch:  out_b = s_b * mid_b + b1_b -------------------
    for b in range(B):                    # static unroll, B is tiny
        seg = slice(b * HW, (b + 1) * HW)
        # branch1: global avg pool (1/(H*W) folded into wb1) is a lane reduce.
        b1 = jnp.maximum(jnp.sum(tb1[:, seg], axis=1, keepdims=True)
                         + bb1_ref[...], 0.0)                   # (Cout, 1)
        o_ref[b, :, :] = s[b:b + 1, :] * mid[:, seg] + b1       # (Cout, HW)


# ----------------------------------------------------------------------------
# Wrapper: one pallas_call, single invocation, everything resident in VMEM
# ----------------------------------------------------------------------------
@jax.jit
def apn_forward(x, ops):
    """x: (B, Cin, H, W) float32 NCHW.  ops: output of prepare_apn_operands."""
    B, Cin, H, W = x.shape
    HW = H * W
    Cout = ops["bmid"].shape[0]
    lane = ops["a3b"].shape[0]

    xb = x.astype(jnp.bfloat16)
    xl = jnp.transpose(xb, (1, 0, 2, 3)).reshape(Cin, B * HW)  # pixels on lanes
    xr = xb.reshape(B, Cin * HW)                               # batch on rows

    flops = 2 * ((2 * Cout) * Cin * (B * HW)        # mid + branch1 stacked dot
                 + B * (Cin * HW) * lane            # down1
                 + 2 * (B * lane * (2 * lane))      # (down2|conv1), (down3a|conv2)
                 + B * lane * lane                  # down3[1]
                 + B * (3 * lane) * HW)             # fused upsample/add chain
    bytes_accessed = ((xl.size + xr.size) * 2 + B * Cout * HW * 4
                      + sum(int(v.size) * v.dtype.itemsize for v in ops.values()))

    vmem = pl.BlockSpec(memory_space=pltpu.MemorySpace.VMEM)
    out = pl.pallas_call(
        _apn_kernel,
        out_shape=jax.ShapeDtypeStruct((B, Cout, HW), jnp.float32),
        in_specs=[vmem] * 11,
        out_specs=vmem,
        cost_estimate=pl.CostEstimate(flops=flops, transcendentals=0,
                                      bytes_accessed=bytes_accessed),
    )(xl, xr, ops["wmb"], ops["bmid"], ops["bb1"],
      ops["a1"], ops["a2c1"], ops["a3ac2"], ops["a3b"], ops["ms"], ops["pyb"])
    return out.reshape(B, Cout, H, W)


# ----------------------------------------------------------------------------
# Host-side (numpy) parameter preparation: fold conv + BN(eval) + resizes into
# dense bf16 operands.  Done once, outside the traced forward.
# ----------------------------------------------------------------------------
def _conv_matrix(wkk, hi, wi, stride, pad):
    """(hi*wi, ho*wo) matrix M: in_row @ M == single-channel PyTorch Conv2d."""
    k = wkk.shape[0]
    ho = (hi + 2 * pad - k) // stride + 1
    wo = (wi + 2 * pad - k) // stride + 1
    m = np.zeros((hi * wi, ho * wo), np.float32)
    for oh in range(ho):
        for ow in range(wo):
            for kh in range(k):
                for kw in range(k):
                    ih = oh * stride + kh - pad
                    iw = ow * stride + kw - pad
                    if 0 <= ih < hi and 0 <= iw < wi:
                        m[ih * wi + iw, oh * wo + ow] += wkk[kh, kw]
    return m


def _interp1d(n_in, n_out):
    """1-D linear interpolation weights, align_corners=True: (n_out, n_in)."""
    w = np.zeros((n_out, n_in), np.float32)
    if n_in == 1:
        w[:, 0] = 1.0
        return w
    src = np.arange(n_out, dtype=np.float64) * (n_in - 1) / (n_out - 1)
    lo = np.clip(np.floor(src).astype(np.int64), 0, n_in - 2)
    frac = (src - lo).astype(np.float32)
    rows = np.arange(n_out)
    w[rows, lo] += 1.0 - frac
    w[rows, lo + 1] += frac
    return w


def _resize_matrix(hi, wi, ho, wo):
    """(hi*wi, ho*wo) matrix: in_row @ M == bilinear align_corners=True resize."""
    return np.kron(_interp1d(hi, ho), _interp1d(wi, wo)).T.astype(np.float32)


def _pad_to(m, rows, cols):
    out = np.zeros((rows, cols), np.float32)
    out[:m.shape[0], :m.shape[1]] = m
    return out


def prepare_apn_operands(params, H, W, lane=LANE):
    """Fold conv weights + BN(eval) + bilinear resizes into the dense bf16
    operands used by the fused kernel.  Specialized to small spatial sizes
    ((H/2)*(W/2) <= 128 pyramid pixels).  Padded pyramid pixels always hit
    zero rows downstream, so their relu(bias) garbage never propagates."""
    assert H % 8 == 0 and W % 8 == 0
    assert (H // 2) * (W // 2) <= lane, "pyramid level must fit in 128 lanes"
    P = {k: {n: np.asarray(v, np.float32) for n, v in d.items()}
         for k, d in params.items()}
    HW = H * W
    cin = P["down1"]["w"].shape[1]

    # 1x1 convs over channels; 1/(H*W) folded into wb1; stacked for one dot.
    wmid = P["mid"]["scale"][:, None] * P["mid"]["w"][:, :, 0, 0]
    wb1 = (P["b1"]["scale"][:, None] * P["b1"]["w"][:, :, 0, 0]) / float(HW)
    wmb = np.concatenate([wmid, wb1], axis=0)             # (2*Cout, Cin)
    bmid = P["mid"]["bias"][:, None]
    bb1 = P["b1"]["bias"][:, None]

    # Cout=1 pyramid convs -> dense pixel->pixel matrices (BN scale folded).
    def stage(name, hi, wi, stride, pad):
        m = _conv_matrix(P[name]["w"][0, 0], hi, wi, stride, pad)
        return _pad_to(m * float(P[name]["scale"][0]), lane, lane)

    # down1: channel contraction folded into one (Cin*HW, lane) operand.
    a1 = np.zeros((cin * HW, lane), np.float32)
    s_d1 = float(P["down1"]["scale"][0])
    for c in range(cin):
        m = _conv_matrix(P["down1"]["w"][0, c], H, W, 2, 3) * s_d1
        a1[c * HW:(c + 1) * HW, :m.shape[1]] = m
    a2 = stage("down2", H // 2, W // 2, 2, 2)
    a3a = stage("down3a", H // 4, W // 4, 2, 1)
    a3b = stage("down3b", H // 8, W // 8, 1, 1)
    ac2 = stage("conv2", H // 4, W // 4, 1, 2)
    ac1 = stage("conv1", H // 2, W // 2, 1, 3)
    a2c1 = np.concatenate([a2, ac1], axis=1)              # (lane, 2*lane)
    a3ac2 = np.concatenate([a3a, ac2], axis=1)            # (lane, 2*lane)

    # Bilinear (align_corners=True) resizes, pre-composed with the add chain:
    #   s = up(H/2->H)( up(H/4->H/2)( conv2(x2) + up(H/8->H/4)(x3) ) + conv1(x1) )
    u24 = _resize_matrix(H // 8, W // 8, H // 4, W // 4)
    u48 = _resize_matrix(H // 4, W // 4, H // 2, W // 2)
    u816 = _resize_matrix(H // 2, W // 2, H, W)
    ms1 = _pad_to(u48 @ u816, lane, HW)                   # multiplies conv2(x2)
    mx3 = _pad_to(u24 @ u48 @ u816, lane, HW)             # multiplies down3 out
    mx1c = _pad_to(u816, lane, HW)                        # multiplies conv1(x1)
    ms = np.concatenate([ms1, mx3, mx1c], axis=0)         # (3*lane, HW)

    # Broadcast scalar biases of the fused Cout=1 stages.
    pyb = np.zeros((8, 2 * lane), np.float32)
    pyb[0, :] = float(P["down1"]["bias"][0])
    pyb[1, :lane] = float(P["down2"]["bias"][0])
    pyb[1, lane:] = float(P["conv1"]["bias"][0])
    pyb[2, :lane] = float(P["down3a"]["bias"][0])
    pyb[2, lane:] = float(P["conv2"]["bias"][0])
    pyb[3, :] = float(P["down3b"]["bias"][0])

    bf16 = jnp.bfloat16
    return dict(
        wmb=jnp.asarray(wmb, bf16),
        bmid=jnp.asarray(bmid, jnp.float32),
        bb1=jnp.asarray(bb1, jnp.float32),
        a1=jnp.asarray(a1, bf16),
        a2c1=jnp.asarray(a2c1, bf16),
        a3ac2=jnp.asarray(a3ac2, bf16),
        a3b=jnp.asarray(a3b, bf16),
        ms=jnp.asarray(ms, bf16),
        pyb=jnp.asarray(pyb, jnp.float32))


# ----------------------------------------------------------------------------
# Parameter construction (deterministic) + plain numpy reference for checking
# ----------------------------------------------------------------------------
def make_cbr_params(key, cin, cout, k, eps=1e-3):
    """Deterministic Conv2dBnRelu parameters with BN(eval) folded to scale/bias."""
    k1, k2, k3, k4, k5, k6 = jax.random.split(key, 6)
    w = 0.1 * jax.random.normal(k1, (cout, cin, k, k), jnp.float32)
    conv_b = 0.1 * jax.random.normal(k2, (cout,), jnp.float32)
    gamma = 1.0 + 0.1 * jax.random.normal(k3, (cout,), jnp.float32)
    beta = 0.1 * jax.random.normal(k4, (cout,), jnp.float32)
    mean = 0.1 * jax.random.normal(k5, (cout,), jnp.float32)
    var = jnp.abs(jax.random.normal(k6, (cout,), jnp.float32)) + 0.5
    scale = gamma / jnp.sqrt(var + eps)
    bias = (conv_b - mean) * scale + beta
    return {"w": w, "scale": scale, "bias": bias}


def _ref_conv_bn_relu(x, w, scale, bias, stride, pad):
    B, Cin, H, W = x.shape
    Cout, _, k, _ = w.shape
    Ho = (H + 2 * pad - k) // stride + 1
    Wo = (W + 2 * pad - k) // stride + 1
    xp = np.pad(x, ((0, 0), (0, 0), (pad, pad), (pad, pad)))
    y = np.zeros((B, Cout, Ho, Wo), np.float32)
    for oh in range(Ho):
        for ow in range(Wo):
            patch = xp[:, :, oh * stride:oh * stride + k,
                       ow * stride:ow * stride + k]
            y[:, :, oh, ow] = np.einsum("bckl,ockl->bo", patch, w)
    y = y * scale[None, :, None, None] + bias[None, :, None, None]
    return np.maximum(y, 0.0)


def _ref_resize(x, Ho, Wo):
    _, _, Hi, Wi = x.shape
    return np.einsum("ih,jw,bchw->bcij",
                     _interp1d(Hi, Ho), _interp1d(Wi, Wo), x).astype(np.float32)


def ref_forward(x, P):
    """Straightforward numpy reference of the APN_Module forward (BN eval)."""
    B, _, H, W = x.shape
    pooled = x.mean(axis=(2, 3), keepdims=True).astype(np.float32)
    b1 = _ref_conv_bn_relu(pooled, P["b1"]["w"], P["b1"]["scale"], P["b1"]["bias"], 1, 0)
    b1 = np.broadcast_to(b1, (B, b1.shape[1], H, W))  # 1x1 -> HxW bilinear
    mid = _ref_conv_bn_relu(x, P["mid"]["w"], P["mid"]["scale"], P["mid"]["bias"], 1, 0)
    x1 = _ref_conv_bn_relu(x, P["down1"]["w"], P["down1"]["scale"], P["down1"]["bias"], 2, 3)
    x2 = _ref_conv_bn_relu(x1, P["down2"]["w"], P["down2"]["scale"], P["down2"]["bias"], 2, 2)
    x3 = _ref_conv_bn_relu(x2, P["down3a"]["w"], P["down3a"]["scale"], P["down3a"]["bias"], 2, 1)
    x3 = _ref_conv_bn_relu(x3, P["down3b"]["w"], P["down3b"]["scale"], P["down3b"]["bias"], 1, 1)
    x3 = _ref_resize(x3, H // 4, W // 4)
    x2c = _ref_conv_bn_relu(x2, P["conv2"]["w"], P["conv2"]["scale"], P["conv2"]["bias"], 1, 2)
    s = x2c + x3
    s = _ref_resize(s, H // 2, W // 2)
    x1c = _ref_conv_bn_relu(x1, P["conv1"]["w"], P["conv1"]["scale"], P["conv1"]["bias"], 1, 3)
    s = s + x1c
    s = _ref_resize(s, H, W)
    return (s * mid + b1).astype(np.float32)


# ----------------------------------------------------------------------------
if __name__ == "__main__":
    key = jax.random.PRNGKey(0)
    in_ch, out_ch = 4, 8
    B, H, W = 2, 16, 16

    ks = jax.random.split(key, 9)
    params = {
        "b1":     make_cbr_params(ks[0], in_ch, out_ch, 1),
        "mid":    make_cbr_params(ks[1], in_ch, out_ch, 1),
        "down1":  make_cbr_params(ks[2], in_ch, 1, 7),
        "down2":  make_cbr_params(ks[3], 1, 1, 5),
        "down3a": make_cbr_params(ks[4], 1, 1, 3),
        "down3b": make_cbr_params(ks[5], 1, 1, 3),
        "conv2":  make_cbr_params(ks[6], 1, 1, 5),
        "conv1":  make_cbr_params(ks[7], 1, 1, 7),
    }
    x = jax.random.normal(ks[8], (B, in_ch, H, W), jnp.float32)

    ops = prepare_apn_operands(params, H, W)          # host-side, once
    out = jax.block_until_ready(apn_forward(x, ops))  # one fused pallas_call

    assert out.shape == (B, out_ch, H, W), out.shape
    assert bool(jnp.all(jnp.isfinite(out)))

    # Numerical check against a direct numpy implementation of the module.
    # Tolerance reflects bf16 operand storage (MXU matmuls on TPU are
    # bf16-class by default anyway); any structural error would be O(1).
    P_np = {k: {n: np.asarray(v, np.float32) for n, v in d.items()}
            for k, d in params.items()}
    ref = ref_forward(np.asarray(x, np.float32), P_np)
    assert np.allclose(np.asarray(out), ref, rtol=1e-2, atol=1e-2), \
        float(np.max(np.abs(np.asarray(out) - ref)))

    print("KERNEL_OK")
</pallas_src>

<mosaic_0001>
module attributes {stable_mosaic.version = 11 : i64} {
  func.func @_apn_kernel(%arg0: memref<4x512xbf16, #tpu.memory_space<vmem>>, %arg1: memref<2x1024xbf16, #tpu.memory_space<vmem>>, %arg2: memref<16x4xbf16, #tpu.memory_space<vmem>>, %arg3: memref<8x1xf32, #tpu.memory_space<vmem>>, %arg4: memref<8x1xf32, #tpu.memory_space<vmem>>, %arg5: memref<1024x128xbf16, #tpu.memory_space<vmem>>, %arg6: memref<128x256xbf16, #tpu.memory_space<vmem>>, %arg7: memref<128x256xbf16, #tpu.memory_space<vmem>>, %arg8: memref<128x128xbf16, #tpu.memory_space<vmem>>, %arg9: memref<384x256xbf16, #tpu.memory_space<vmem>>, %arg10: memref<8x256xf32, #tpu.memory_space<vmem>>, %arg11: memref<2x8x256xf32, #tpu.memory_space<vmem>>) attributes {dimension_semantics = [], scalar_prefetch = 0 : i64, scratch_operands = 0 : i64, tpu.core_type = #tpu.core_type<tc>} {
    %c0 = arith.constant 0 : index
    %c0_0 = arith.constant 0 : index
    %0 = vector.load %arg0[%c0, %c0_0] : memref<4x512xbf16, #tpu.memory_space<vmem>>, vector<4x512xbf16>
    %c0_1 = arith.constant 0 : index
    %c0_2 = arith.constant 0 : index
    %1 = vector.load %arg1[%c0_1, %c0_2] : memref<2x1024xbf16, #tpu.memory_space<vmem>>, vector<2x1024xbf16>
    %c0_3 = arith.constant 0 : index
    %c0_4 = arith.constant 0 : index
    %2 = vector.load %arg10[%c0_3, %c0_4] : memref<8x256xf32, #tpu.memory_space<vmem>>, vector<8x256xf32>
    %c0_5 = arith.constant 0 : index
    %c0_6 = arith.constant 0 : index
    %3 = vector.load %arg2[%c0_5, %c0_6] : memref<16x4xbf16, #tpu.memory_space<vmem>>, vector<16x4xbf16>
    %cst = arith.constant dense<0.000000e+00> : vector<16x512xf32>
    %4 = tpu.matmul %3, %0, %cst {dimension_numbers = #tpu.dot_dimension_numbers<[1], [0], [0], [1], [0, 0, 1, 1], [], []>} : vector<16x4xbf16>, vector<4x512xbf16>, vector<16x512xf32> -> vector<16x512xf32>
    %5 = vector.extract_strided_slice %4 {offsets = [0, 0], sizes = [8, 512], strides = [1, 1]} : vector<16x512xf32> to vector<8x512xf32>
    %c0_7 = arith.constant 0 : index
    %c0_8 = arith.constant 0 : index
    %6 = vector.load %arg3[%c0_7, %c0_8] : memref<8x1xf32, #tpu.memory_space<vmem>>, vector<8x1xf32>
    %7 = vector.broadcast %6 : vector<8x1xf32> to vector<8x512xf32>
    %8 = arith.addf %5, %7 : vector<8x512xf32>
    %cst_9 = arith.constant 0.000000e+00 : f32
    %9 = vector.broadcast %cst_9 : f32 to vector<8x512xf32>
    %10 = arith.maximumf %8, %9 : vector<8x512xf32>
    %11 = vector.extract_strided_slice %4 {offsets = [8, 0], sizes = [8, 512], strides = [1, 1]} : vector<16x512xf32> to vector<8x512xf32>
    %c0_10 = arith.constant 0 : index
    %c0_11 = arith.constant 0 : index
    %12 = vector.load %arg5[%c0_10, %c0_11] : memref<1024x128xbf16, #tpu.memory_space<vmem>>, vector<1024x128xbf16>
    %cst_12 = arith.constant dense<0.000000e+00> : vector<2x128xf32>
    %13 = tpu.matmul %1, %12, %cst_12 {dimension_numbers = #tpu.dot_dimension_numbers<[1], [0], [0], [1], [0, 0, 1, 1], [], []>} : vector<2x1024xbf16>, vector<1024x128xbf16>, vector<2x128xf32> -> vector<2x128xf32>
    %14 = vector.extract_strided_slice %2 {offsets = [0, 0], sizes = [1, 128], strides = [1, 1]} : vector<8x256xf32> to vector<1x128xf32>
    %15 = vector.broadcast %14 : vector<1x128xf32> to vector<2x128xf32>
    %16 = arith.addf %13, %15 : vector<2x128xf32>
    %cst_13 = arith.constant 0.000000e+00 : f32
    %17 = vector.broadcast %cst_13 : f32 to vector<2x128xf32>
    %18 = arith.maximumf %16, %17 : vector<2x128xf32>
    %19 = arith.truncf %18 : vector<2x128xf32> to vector<2x128xbf16>
    %c0_14 = arith.constant 0 : index
    %c0_15 = arith.constant 0 : index
    %20 = vector.load %arg6[%c0_14, %c0_15] : memref<128x256xbf16, #tpu.memory_space<vmem>>, vector<128x256xbf16>
    %cst_16 = arith.constant dense<0.000000e+00> : vector<2x256xf32>
    %21 = tpu.matmul %19, %20, %cst_16 {dimension_numbers = #tpu.dot_dimension_numbers<[1], [0], [0], [1], [0, 0, 1, 1], [], []>} : vector<2x128xbf16>, vector<128x256xbf16>, vector<2x256xf32> -> vector<2x256xf32>
    %22 = vector.extract_strided_slice %2 {offsets = [1, 0], sizes = [1, 256], strides = [1, 1]} : vector<8x256xf32> to vector<1x256xf32>
    %23 = vector.broadcast %22 : vector<1x256xf32> to vector<2x256xf32>
    %24 = arith.addf %21, %23 : vector<2x256xf32>
    %cst_17 = arith.constant 0.000000e+00 : f32
    %25 = vector.broadcast %cst_17 : f32 to vector<2x256xf32>
    %26 = arith.maximumf %24, %25 : vector<2x256xf32>
    %27 = vector.extract_strided_slice %26 {offsets = [0, 0], sizes = [2, 128], strides = [1, 1]} : vector<2x256xf32> to vector<2x128xf32>
    %28 = vector.extract_strided_slice %26 {offsets = [0, 128], sizes = [2, 128], strides = [1, 1]} : vector<2x256xf32> to vector<2x128xf32>
    %29 = arith.truncf %27 : vector<2x128xf32> to vector<2x128xbf16>
    %c0_18 = arith.constant 0 : index
    %c0_19 = arith.constant 0 : index
    %30 = vector.load %arg7[%c0_18, %c0_19] : memref<128x256xbf16, #tpu.memory_space<vmem>>, vector<128x256xbf16>
    %cst_20 = arith.constant dense<0.000000e+00> : vector<2x256xf32>
    %31 = tpu.matmul %29, %30, %cst_20 {dimension_numbers = #tpu.dot_dimension_numbers<[1], [0], [0], [1], [0, 0, 1, 1], [], []>} : vector<2x128xbf16>, vector<128x256xbf16>, vector<2x256xf32> -> vector<2x256xf32>
    %32 = vector.extract_strided_slice %2 {offsets = [2, 0], sizes = [1, 256], strides = [1, 1]} : vector<8x256xf32> to vector<1x256xf32>
    %33 = vector.broadcast %32 : vector<1x256xf32> to vector<2x256xf32>
    %34 = arith.addf %31, %33 : vector<2x256xf32>
    %cst_21 = arith.constant 0.000000e+00 : f32
    %35 = vector.broadcast %cst_21 : f32 to vector<2x256xf32>
    %36 = arith.maximumf %34, %35 : vector<2x256xf32>
    %37 = vector.extract_strided_slice %36 {offsets = [0, 0], sizes = [2, 128], strides = [1, 1]} : vector<2x256xf32> to vector<2x128xf32>
    %38 = vector.extract_strided_slice %36 {offsets = [0, 128], sizes = [2, 128], strides = [1, 1]} : vector<2x256xf32> to vector<2x128xf32>
    %39 = arith.truncf %37 : vector<2x128xf32> to vector<2x128xbf16>
    %c0_22 = arith.constant 0 : index
    %c0_23 = arith.constant 0 : index
    %40 = vector.load %arg8[%c0_22, %c0_23] : memref<128x128xbf16, #tpu.memory_space<vmem>>, vector<128x128xbf16>
    %cst_24 = arith.constant dense<0.000000e+00> : vector<2x128xf32>
    %41 = tpu.matmul %39, %40, %cst_24 {dimension_numbers = #tpu.dot_dimension_numbers<[1], [0], [0], [1], [0, 0, 1, 1], [], []>} : vector<2x128xbf16>, vector<128x128xbf16>, vector<2x128xf32> -> vector<2x128xf32>
    %42 = vector.extract_strided_slice %2 {offsets = [3, 0], sizes = [1, 128], strides = [1, 1]} : vector<8x256xf32> to vector<1x128xf32>
    %43 = vector.broadcast %42 : vector<1x128xf32> to vector<2x128xf32>
    %44 = arith.addf %41, %43 : vector<2x128xf32>
    %cst_25 = arith.constant 0.000000e+00 : f32
    %45 = vector.broadcast %cst_25 : f32 to vector<2x128xf32>
    %46 = arith.maximumf %44, %45 : vector<2x128xf32>
    %47 = tpu.concatenate %38, %46, %28 in 1 : vector<2x128xf32>, vector<2x128xf32>, vector<2x128xf32> -> vector<2x384xf32>
    %48 = arith.truncf %47 : vector<2x384xf32> to vector<2x384xbf16>
    %c0_26 = arith.constant 0 : index
    %c0_27 = arith.constant 0 : index
    %49 = vector.load %arg9[%c0_26, %c0_27] : memref<384x256xbf16, #tpu.memory_space<vmem>>, vector<384x256xbf16>
    %cst_28 = arith.constant dense<0.000000e+00> : vector<2x256xf32>
    %50 = tpu.matmul %48, %49, %cst_28 {dimension_numbers = #tpu.dot_dimension_numbers<[1], [0], [0], [1], [0, 0, 1, 1], [], []>} : vector<2x384xbf16>, vector<384x256xbf16>, vector<2x256xf32> -> vector<2x256xf32>
    %51 = vector.extract_strided_slice %11 {offsets = [0, 0], sizes = [8, 256], strides = [1, 1]} : vector<8x512xf32> to vector<8x256xf32>
    %cst_29 = arith.constant dense<0.000000e+00> : vector<8xf32>
    %52 = vector.multi_reduction <add>, %51, %cst_29 [1] : vector<8x256xf32> to vector<8xf32>
    %53 = vector.shape_cast %52 : vector<8xf32> to vector<8x1xf32>
    %c0_30 = arith.constant 0 : index
    %c0_31 = arith.constant 0 : index
    %54 = vector.load %arg4[%c0_30, %c0_31] : memref<8x1xf32, #tpu.memory_space<vmem>>, vector<8x1xf32>
    %55 = arith.addf %53, %54 : vector<8x1xf32>
    %cst_32 = arith.constant 0.000000e+00 : f32
    %56 = vector.broadcast %cst_32 : f32 to vector<8x1xf32>
    %57 = arith.maximumf %55, %56 : vector<8x1xf32>
    %58 = vector.extract_strided_slice %50 {offsets = [0, 0], sizes = [1, 256], strides = [1, 1]} : vector<2x256xf32> to vector<1x256xf32>
    %59 = vector.extract_strided_slice %10 {offsets = [0, 0], sizes = [8, 256], strides = [1, 1]} : vector<8x512xf32> to vector<8x256xf32>
    %60 = vector.broadcast %58 : vector<1x256xf32> to vector<8x256xf32>
    %61 = arith.mulf %60, %59 : vector<8x256xf32>
    %62 = vector.broadcast %57 : vector<8x1xf32> to vector<8x256xf32>
    %63 = arith.addf %61, %62 : vector<8x256xf32>
    %c0_33 = arith.constant 0 : index
    %c0_34 = arith.constant 0 : index
    %c0_35 = arith.constant 0 : index
    %64 = vector.load %arg11[%c0_33, %c0_34, %c0_35] : memref<2x8x256xf32, #tpu.memory_space<vmem>>, vector<1x8x256xf32>
    %65 = vector.shape_cast %64 : vector<1x8x256xf32> to vector<8x256xf32>
    %66 = vector.shape_cast %63 : vector<8x256xf32> to vector<1x8x256xf32>
    tpu.vector_store %arg11[%c0_33, %c0_34, %c0_35], %66 {strides = array<i32>} : memref<2x8x256xf32, #tpu.memory_space<vmem>>, vector<1x8x256xf32>,
    %67 = vector.extract_strided_slice %11 {offsets = [0, 256], sizes = [8, 256], strides = [1, 1]} : vector<8x512xf32> to vector<8x256xf32>
    %cst_36 = arith.constant dense<0.000000e+00> : vector<8xf32>
    %68 = vector.multi_reduction <add>, %67, %cst_36 [1] : vector<8x256xf32> to vector<8xf32>
    %69 = vector.shape_cast %68 : vector<8xf32> to vector<8x1xf32>
    %c0_37 = arith.constant 0 : index
    %c0_38 = arith.constant 0 : index
    %70 = vector.load %arg4[%c0_37, %c0_38] : memref<8x1xf32, #tpu.memory_space<vmem>>, vector<8x1xf32>
    %71 = arith.addf %69, %70 : vector<8x1xf32>
    %cst_39 = arith.constant 0.000000e+00 : f32
    %72 = vector.broadcast %cst_39 : f32 to vector<8x1xf32>
    %73 = arith.maximumf %71, %72 : vector<8x1xf32>
    %74 = vector.extract_strided_slice %50 {offsets = [1, 0], sizes = [1, 256], strides = [1, 1]} : vector<2x256xf32> to vector<1x256xf32>
    %75 = vector.extract_strided_slice %10 {offsets = [0, 256], sizes = [8, 256], strides = [1, 1]} : vector<8x512xf32> to vector<8x256xf32>
    %76 = vector.broadcast %74 : vector<1x256xf32> to vector<8x256xf32>
    %77 = arith.mulf %76, %75 : vector<8x256xf32>
    %78 = vector.broadcast %73 : vector<8x1xf32> to vector<8x256xf32>
    %79 = arith.addf %77, %78 : vector<8x256xf32>
    %c1 = arith.constant 1 : index
    %c0_40 = arith.constant 0 : index
    %c0_41 = arith.constant 0 : index
    %80 = vector.load %arg11[%c1, %c0_40, %c0_41] : memref<2x8x256xf32, #tpu.memory_space<vmem>>, vector<1x8x256xf32>
    %81 = vector.shape_cast %80 : vector<1x8x256xf32> to vector<8x256xf32>
    %82 = vector.shape_cast %79 : vector<8x256xf32> to vector<1x8x256xf32>
    tpu.vector_store %arg11[%c1, %c0_40, %c0_41], %82 {strides = array<i32>} : memref<2x8x256xf32, #tpu.memory_space<vmem>>, vector<1x8x256xf32>,
    return
  }
}

</mosaic_0001>

<bundles_post_ra>
// kernel: apn_forward.1
= control target key start
LH: loop header
LB: loop body
LE: loop exit
PB: predicated region body
PF: predicated region fallthrough
CT: control target
= control target key end

     0   :  { %16 = vsyncpa [#allocation3], 0  ;;  %s2767_s0 = inlined_call_operand.vmem [shape: bf16[4,512], index: 0, kind: input, shape index: {}]   ;;  %s2768_s1 = inlined_call_operand.vmem [shape: bf16[2,1024], index: 1, kind: input, shape index: {}]   ;;  %s2769_s2 = inlined_call_operand.vmem [shape: bf16[16,4], index: 2, kind: input, shape index: {}]   ;;  %s2770_s3 = inlined_call_operand.vmem [shape: f32[8,1], index: 3, kind: input, shape index: {}]   ;;  %s2771_s4 = inlined_call_operand.vmem [shape: f32[8,1], index: 4, kind: input, shape index: {}]   ;;  %s2772_s5 = inlined_call_operand.vmem [shape: bf16[1024,128], index: 5, kind: input, shape index: {}]   ;;  %s2773_s6 = inlined_call_operand.hbm [shape: bf16[128,256], index: 6, kind: input, shape index: {}]   ;;  %s2774_s7 = inlined_call_operand.hbm [shape: bf16[128,256], index: 7, kind: input, shape index: {}]   ;;  %s2775_s8 = inlined_call_operand.hbm [shape: bf16[128,128], index: 8, kind: input, shape index: {}]   ;;  %s2776_s9 = inlined_call_operand.hbm [shape: bf16[384,256], index: 9, kind: input, shape index: {}]   ;;  %s2777_s10 = inlined_call_operand.vmem [shape: f32[8,256], index: 10, kind: input, shape index: {}]   ;;  %s2778_s11 = inlined_call_operand.vmem [shape: f32[2,8,256], index: 11, kind: output, shape index: {}]  }
   0x1   :  { %17 = vsyncpa [#allocation5], 0 }
   0x2   :  { %18 = vsyncpa [#allocation8], 0  ;;  %s2384_s17 = smov [#allocation4]   ;;  %s2385_s19 = smov [#allocation2]  }
   0x3   :  { %s48_s18 = sshll.u32 %s2384_s17, 4  ;;  %s36_s20 = sshll.u32 %s2385_s19, 4  ;;  %s49_s18 = int_to_ptr.vmem [resolvable:$true] %s48_s18  ;;  %s37_s20 = int_to_ptr.vmem [resolvable:$true] %s36_s20 }
   0x4   :  { %s2306_s21 = scalar_lea.vmem %s49_s18, 2048  ;;  %p2311_p1 = scmp.lt.s32.totalorder %s49_s18, %s49_s18 }
   0x5   :  { %p2307_p0 = scmp.ne.s32.totalorder %s49_s18, %s2306_s21  ;;  %p2312_p2 = scmp.lt.s32.totalorder %s2306_s21, %s2306_s21 }
   0x7   :  { %p2313_p3 = por %p2312_p2, %p2311_p1 }
   0x9   :  { %p2314_p4 = pnand %p2313_p3, %p2307_p0 }
   0xb   :  { %2317 = shalt.err (!%p2314_p4)
}
   0xc   :  { %s2386_s22 = smov 128   ;;  %s2387_s23 = smov 8  }
   0xd   :  { %54 = dma.hbm_to_vmem [thread:$0]  %s2774_s7, 2048, %s49_s18, [#allocation5], %s2386_s22, %s2386_s22, %s2387_s23  }
   0xe   :  { %s2326_s26 = scalar_lea.vmem %s37_s20, 2048  ;;  %p2331_p6 = scmp.lt.s32.totalorder %s37_s20, %s37_s20 }
   0xf   :  { %p2327_p5 = scmp.ne.s32.totalorder %s37_s20, %s2326_s26  ;;  %p2332_p7 = scmp.lt.s32.totalorder %s2326_s26, %s2326_s26 }
  0x11   :  { %p2333_p8 = por %p2332_p7, %p2331_p6 }
  0x13   :  { %p2334_p9 = pnand %p2333_p8, %p2327_p5 }
  0x15   :  { %2337 = shalt.err (!%p2334_p9)
}
  0x16   :  { %42 = dma.hbm_to_vmem [thread:$0]  %s2773_s6, 2048, %s37_s20, [#allocation3], %s2386_s22, %s2386_s22, %s2387_s23  }
  0x17   :  { %s2388_s29 = smov [#allocation6]  }
  0x18   :  { %s60_s30 = sshll.u32 %s2388_s29, 4  ;;  %s61_s30 = int_to_ptr.vmem [resolvable:$true] %s60_s30 }
  0x19   :  { %s2346_s12 = scalar_lea.vmem %s61_s30, 1024  ;;  %p2351_p11 = scmp.lt.s32.totalorder %s61_s30, %s61_s30 }
  0x1a   :  { %p2347_p10 = scmp.ne.s32.totalorder %s61_s30, %s2346_s12  ;;  %p2352_p12 = scmp.lt.s32.totalorder %s2346_s12, %s2346_s12 }
  0x1c   :  { %p2353_p13 = por %p2352_p12, %p2351_p11 }
  0x1e   :  { %p2354_p0 = pnand %p2353_p13, %p2347_p10 }
  0x20   :  { %2357 = shalt.err (!%p2354_p0)
}
  0x21   :  { %s2389_s7 = smov 64   ;;  %s2390_s13 = smov 4  }
  0x22   :  { %66 = dma.hbm_to_vmem [thread:$0]  %s2775_s8, 1024, %s61_s30, [#allocation5], %s2389_s7, %s2389_s7, %s2390_s13  }
  0x23   :  { %s2391_s16 = smov [#allocation7]  }
  0x24   :  { %s72_s17 = sshll.u32 %s2391_s16, 4  ;;  %s73_s17 = int_to_ptr.vmem [resolvable:$true] %s72_s17 }
  0x25   :  { %s2366_s6 = scalar_lea.vmem %s73_s17, 6144  ;;  %p2371_p2 = scmp.lt.s32.totalorder %s73_s17, %s73_s17 }
  0x26   :  { %p2367_p1 = scmp.ne.s32.totalorder %s73_s17, %s2366_s6  ;;  %p2372_p3 = scmp.lt.s32.totalorder %s2366_s6, %s2366_s6 }
  0x28   :  { %p2373_p4 = por %p2372_p3, %p2371_p2 }
  0x2a   :  { %p2374_p5 = pnand %p2373_p4, %p2367_p1 }
  0x2c   :  { %2377 = shalt.err (!%p2374_p5)
}
  0x2d   :  { %78 = dma.hbm_to_vmem [thread:$0]  %s2776_s9, 6144, %s73_s17, [#allocation8], %s2386_s22, %s2386_s22, %s2387_s23  }
  0x2e   :  { %2378 = dma.done.wait [#allocation3], 2048  }
  0x2f   :  { %2379 = vsyncadd [#allocation3], 4294965248 }
  0x30   :  { %2380 = dma.done.wait [#allocation5], 3072  }
  0x31   :  { %2381 = vsyncadd [#allocation5], 4294964224 }
  0x32   :  { %2382 = dma.done.wait [#allocation8], 6144  }
  0x33   :  { %2383 = vsyncadd [#allocation8], 4294961152  ;;  %v110_v0 = vlaneseq  ;;  %v2392_v1 = vmov 1983009808   ;;  %v2393_v3 = vmov 0   ;;  %v94_v7 = vld [vmem:[%s2767_s0] sm:$0xff] }
  0x34   :  { %v108_v2 = vunpack.c.l.s4 %v2392_v1  ;;  %172 = vmatprep.mubr.bf16.mxu0 %v2393_v3  ;;  %215 = vmatprep.mubr.bf16.mxu1 %v2393_v3  ;;  %vm127_vm0 = vcmask 1041408   ;;  %v106_v9 = vcombine.high %v94_v7, %v94_v7  ;;  %v2104_v13 = vld [vmem:[%s2769_s2] sm:$0xff]   ;;  %v2105_v14 = vld [vmem:[%s2772_s5 + $0x78] sm:$0xff]   ;;  %vm123_vm1 = vcmask 31744   ;;  %v2109_v20 = vld [vmem:[%s2772_s5 + $0x70] sm:$0xff]  }
  0x35   :  { %v2480_v4 = vshrl.u32 %v110_v0, 7  ;;  %2101 = vset.pattern.permute.xlu1 %v2393_v3  ;;  %2102 = vset.pattern.permute.xlu0 %v2393_v3  ;;  %v2106_v15 = vld [vmem:[%s2772_s5 + $0x38] sm:$0xff]   ;;  %v2110_v21 = vld [vmem:[%s2772_s5 + $0x30] sm:$0xff]   ;;  %v2113_v24 = vld [vmem:[%s2772_s5 + $0x68] sm:$0xff]   ;;  %v2394_v35 = vmov 1966171168  }
  0x36   :  { %v109_v5 = vunpack.c.0.s8 %v108_v2  ;;  %v2107_v18 = vld [vmem:[%s2772_s5 + $0xf8] sm:$0xff]   ;;  %v2111_v22 = vld [vmem:[%s2772_s5 + $0xf0] sm:$0xff]   ;;  %v2114_v25 = vld [vmem:[%s2772_s5 + $0x28] sm:$0xff]   ;;  %v375_v36 = vunpack.c.l.s4 %v2394_v35  ;;  %vm2396_vm2 = vmmov 0  }
  0x37   :  { %v2108_v19 = vld [vmem:[%s2772_s5 + $0xb8] sm:$0xff]   ;;  %v2112_v23 = vld [vmem:[%s2772_s5 + $0xb0] sm:$0xff]   ;;  %v2115_v26 = vld [vmem:[%s2772_s5 + $0xe8] sm:$0xff]  }
  0x38   :  { %v112_v6 = vsub.s32 %v109_v5, %v2480_v4  ;;  %v2116_v27 = vld [vmem:[%s2772_s5 + $0xa8] sm:$0xff]   ;;  %v2117_v28 = vld [vmem:[%s2772_s5 + $0x60] sm:$0xff]   ;;  %v2121_v32 = vld [vmem:[%s2772_s5 + $0x58] sm:$0xff]   ;;  %v376_v41 = vunpack.c.0.s8 %v375_v36 }
  0x39   :  { %v2118_v29 = vld [vmem:[%s2772_s5 + $0x20] sm:$0xff]   ;;  %v2122_v33 = vld [vmem:[%s2772_s5 + $0x18] sm:$0xff]   ;;  %v2125_v38 = vld [vmem:[%s2772_s5 + $0x50] sm:$0xff]  }
  0x3a   :  { %v113_v8 = vrot.slane %v94_v7, %v112_v6  ;;  %v120_v12 = vrot.slane %v106_v9, %v112_v6  ;;  %v2119_v30 = vld [vmem:[%s2772_s5 + $0xe0] sm:$0xff]   ;;  %v2123_v34 = vld [vmem:[%s2772_s5 + $0xd8] sm:$0xff]   ;;  %v2126_v39 = vld [vmem:[%s2772_s5 + $0x10] sm:$0xff]   ;;  %v2577_v46 = vsub.s32 %v376_v41, %v2480_v4 }
  0x3b   :  { %v2120_v31 = vld [vmem:[%s2772_s5 + $0xa0] sm:$0xff]   ;;  %v2124_v37 = vld [vmem:[%s2772_s5 + $0x98] sm:$0xff]   ;;  %v2127_v40 = vld [vmem:[%s2772_s5 + $0xd0] sm:$0xff]  }
  0x3c   :  { %v121_v10 = vcombine.high %v113_v8, %v113_v8  ;;  %v129_v11 = vsel %vm127_vm0, %v113_v8, 0  ;;  %v122_v16 = vcombine.high %v120_v12, %v120_v12  ;;  %v135_v17 = vsel %vm127_vm0, %v120_v12, 0  ;;  %v2128_v42 = vld [vmem:[%s2772_s5 + $0x90] sm:$0xff]   ;;  %v2129_v43 = vld [vmem:[%s2772_s5 + $0x48] sm:$0xff]   ;;  %v2133_v48 = vld [vmem:[%s2772_s5 + $0x40] sm:$0xff]  }
  0x3d   :  { %v2130_v44 = vld [vmem:[%s2772_s5 + $0x8] sm:$0xff]   ;;  %v2134_v49 = vld [vmem:[%s2772_s5] sm:$0xff]   ;;  %v2137_v57 = vld [vmem:[%s2772_s5 + $0x178] sm:$0xff]  }
  0x3e   :  { %1813 = vmatprep.subr.msk.bf16.mxu0 %vm127_vm0, %v121_v10  ;;  %1815 = vmatprep.subr.msk.bf16.mxu1 %vm127_vm0, %v122_v16  ;;  %v2131_v45 = vld [vmem:[%s2772_s5 + $0xc8] sm:$0xff]   ;;  %v95_v50 = vld [vmem:[%s2768_s1] sm:$0xff]  ;;  %v2138_v59 = vld [vmem:[%s2772_s5 + $0x138] sm:$0xff]  }
  0x3f   :  { %155 = vmatpush1.bf16.msra.mxu0 %v129_v11  ;;  %198 = vmatpush1.bf16.msra.mxu1 %v135_v17  ;;  %v2132_v47 = vld [vmem:[%s2772_s5 + $0x88] sm:$0xff]   ;;  %v2135_v51 = vld [vmem:[%s2772_s5 + $0xc0] sm:$0xff]   ;;  %v380_v52 = vrot.slane %v95_v50, %v2577_v46  ;;  %v373_v53 = vcombine.high %v95_v50, %v95_v50  ;;  %v2139_v61 = vld [vmem:[%s2772_s5 + $0x1f8] sm:$0xff]  }
  0x40   :  { %1971 = vmatprep.subr.bf16.mxu0 %v2105_v14  ;;  %1993 = vmatprep.subr.bf16.mxu1 %v2107_v18  ;;  %v2136_v54 = vld [vmem:[%s2772_s5 + $0x80] sm:$0xff]   ;;  %v2140_v63 = vld [vmem:[%s2772_s5 + $0x1b8] sm:$0xff]   ;;  %v2141_v2 = vld [vmem:[%s2772_s5 + $0x170] sm:$0xff]  }
  0x41   :  { %v388_v55 = vcombine.high %v380_v52, %v380_v52  ;;  %v396_v56 = vrot.slane %v380_v52, %v2577_v46  ;;  %v2603_v58 = vrot.slane %v373_v53, %v2577_v46  ;;  %v2142_v6 = vld [vmem:[%s2772_s5 + $0x130] sm:$0xff]   ;;  %v2145_v10 = vld [vmem:[%s2772_s5 + $0x168] sm:$0xff]   ;;  %v2149_v14 = vld [vmem:[%s2772_s5 + $0x160] sm:$0xff]  }
  0x42   :  { %1814 = vmatmul.mubr.msk.bf16.vlgmr.msra.gmra.mxu0 %vm123_vm1, %v2104_v13  ;;  %1816 = vmatmul.mubr.msk.bf16.vlgmr.msra.gmra.mxu1 %vm123_vm1, %v2104_v13  ;;  %v2143_v7 = vld [vmem:[%s2772_s5 + $0x1f0] sm:$0xff]   ;;  %v2146_v11 = vld [vmem:[%s2772_s5 + $0x128] sm:$0xff]   ;;  %v2151_v16 = vld [vmem:[%s2772_s5 + $0x1e0] sm:$0xff]  }
  0x43   :  { %1972 = vmatpush3.bf16.msra.mxu0 %v2106_v15  ;;  %1994 = vmatpush3.bf16.msra.mxu1 %v2108_v19  ;;  %v410_v60 = vrot.slane %v388_v55, %v2577_v46  ;;  %v389_v62 = vcombine.high %v2603_v58, %v2603_v58  ;;  %v418_v1 = vcombine.high %v396_v56, %v396_v56  ;;  %v2144_v9 = vld [vmem:[%s2772_s5 + $0x1b0] sm:$0xff]   ;;  %v2147_v12 = vld [vmem:[%s2772_s5 + $0x1e8] sm:$0xff]   ;;  %v2150_v15 = vld [vmem:[%s2772_s5 + $0x120] sm:$0xff]  }
  0x44   :  { %1973 = vmatprep.subr.bf16.mxu0 %v2109_v20  ;;  %1995 = vmatprep.subr.bf16.mxu1 %v2111_v22  ;;  %v2148_v13 = vld [vmem:[%s2772_s5 + $0x1a8] sm:$0xff]   ;;  %v2152_v17 = vld [vmem:[%s2772_s5 + $0x1a0] sm:$0xff]   ;;  %v2153_v18 = vld [vmem:[%s2772_s5 + $0x158] sm:$0xff]   ;;  %v403_v35 = vrot.slane %v2603_v58, %v2577_v46 }
  0x45   :  { %846 = vmatprep.mubr.bf16.mxu0 %v410_v60  ;;  %v420_v0 = vcombine.high %v410_v60, %v410_v60  ;;  %v417_v5 = vrot.slane %v389_v62, %v2577_v46  ;;  %v2154_v19 = vld [vmem:[%s2772_s5 + $0x118] sm:$0xff]   ;;  %v2157_v22 = vld [vmem:[%s2772_s5 + $0x150] sm:$0xff]   ;;  %v2191_v52 = vld [vmem:[#allocation2] ss:$8 sps:$4 sm:$0xff]  }
  0x46   :  { %v2155_v20 = vld [vmem:[%s2772_s5 + $0x1d8] sm:$0xff]   ;;  %v419_v36 = vcombine.high %v403_v35, %v403_v35 }
  0x47   :  { %1974 = vmatpush3.bf16.msra.mxu0 %v2110_v21  ;;  %1996 = vmatpush3.bf16.msra.mxu1 %v2112_v23  ;;  %v421_v8 = vcombine.high %v417_v5, %v417_v5  ;;  %v2156_v21 = vld [vmem:[%s2772_s5 + $0x198] sm:$0xff]   ;;  %v2158_v23 = vld [vmem:[%s2772_s5 + $0x110] sm:$0xff]  }
  0x48   :  { %1975 = vmatprep.subr.bf16.mxu0 %v2113_v24  ;;  %1997 = vmatprep.subr.bf16.mxu1 %v2115_v26  ;;  %v2159_v24 = vld [vmem:[%s2772_s5 + $0x1d0] sm:$0xff]   ;;  %v2161_v26 = vld [vmem:[%s2772_s5 + $0x148] sm:$0xff]  }
  0x49   :  { %886 = vmatprep.mubr.bf16.mxu1 %v420_v0  ;;  %v2178_v41 = vld [vmem:[#allocation2 + $0x54] ss:$8 sps:$4 sm:$0xff]   ;;  %v2182_v46 = vld [vmem:[#allocation2 + $0x30] ss:$8 sps:$4 sm:$0xff]  }
  0x4a   :  { %v2188_v50 = vld [vmem:[#allocation2 + $0x10] ss:$8 sps:$4 sm:$0xff]   ;;  %v2196_v0 = vld [vmem:[#allocation4 + $0x74] ss:$8 sps:$4 sm:$0xff]  }
  0x4b   :  { %1976 = vmatpush3.bf16.msra.mxu0 %v2114_v25  ;;  %1998 = vmatpush3.bf16.msra.mxu1 %v2116_v27  ;;  %v2160_v25 = vld [vmem:[%s2772_s5 + $0x190] sm:$0xff]   ;;  %v2162_v27 = vld [vmem:[%s2772_s5 + $0x108] sm:$0xff]  }
  0x4c   :  { %1977 = vmatprep.subr.bf16.mxu0 %v2117_v28  ;;  %1999 = vmatprep.subr.bf16.mxu1 %v2119_v30  ;;  %v2163_v28 = vld [vmem:[%s2772_s5 + $0x1c8] sm:$0xff]   ;;  %v2165_v30 = vld [vmem:[%s2772_s5 + $0x140] sm:$0xff]  }
  0x4f   :  { %1978 = vmatpush3.bf16.msra.mxu0 %v2118_v29  ;;  %2000 = vmatpush3.bf16.msra.mxu1 %v2120_v31  ;;  %v2164_v29 = vld [vmem:[%s2772_s5 + $0x188] sm:$0xff]   ;;  %v2166_v31 = vld [vmem:[%s2772_s5 + $0x100] sm:$0xff]  }
  0x50   :  { %1979 = vmatprep.subr.bf16.mxu0 %v2121_v32  ;;  %2001 = vmatprep.subr.bf16.mxu1 %v2123_v34  ;;  %v2167_v32 = vld [vmem:[%s2772_s5 + $0x1c0] sm:$0xff]  }
  0x51   :  { %v2169_v34 = vld [vmem:[%s2772_s5 + $0x180] sm:$0xff]  }
  0x53   :  { %1980 = vmatpush3.bf16.msra.mxu0 %v2122_v33  ;;  %2002 = vmatpush3.bf16.msra.mxu1 %v2124_v37  ;;  %v226_v33 = vld [vmem:[%s2770_s3] sm:$0xff]  ;;  %v2170_v37 = vld [vmem:[#allocation2 + $0x70] ss:$8 sps:$4 sm:$0xff]  }
  0x54   :  { %1981 = vmatprep.subr.bf16.mxu0 %v2125_v38  ;;  %2003 = vmatprep.subr.bf16.mxu1 %v2127_v40  ;;  %v2172_v38 = vld [vmem:[#allocation2 + $0x74] ss:$8 sps:$4 sm:$0xff]   ;;  %v2173_v40 = vld [vmem:[#allocation2 + $0x60] ss:$8 sps:$4 sm:$0xff]  }
  0x55   :  { %229 = vperm.xlu1 %2101, %v226_v33  }
  0x57   :  { %1982 = vmatpush3.bf16.msra.mxu0 %v2126_v39  ;;  %2004 = vmatpush3.bf16.msra.mxu1 %v2128_v42  ;;  %v2175_v39 = vld [vmem:[#allocation2 + $0x64] ss:$8 sps:$4 sm:$0xff]   ;;  %v2176_v42 = vld [vmem:[#allocation2 + $0x50] ss:$8 sps:$4 sm:$0xff]  }
  0x58   :  { %1983 = vmatprep.subr.bf16.mxu0 %v2129_v43  ;;  %2005 = vmatprep.subr.bf16.mxu1 %v2131_v45  ;;  %v2181_v43 = vld [vmem:[#allocation2 + $0x44] ss:$8 sps:$4 sm:$0xff]   ;;  %v2184_v45 = vld [vmem:[#allocation2 + $0x34] ss:$8 sps:$4 sm:$0xff]  }
  0x5b   :  { %1984 = vmatpush3.bf16.msra.mxu0 %v2130_v44  ;;  %2006 = vmatpush3.bf16.msra.mxu1 %v2132_v47  ;;  %v2179_v44 = vld [vmem:[#allocation2 + $0x40] ss:$8 sps:$4 sm:$0xff]   ;;  %v2187_v47 = vld [vmem:[#allocation2 + $0x24] ss:$8 sps:$4 sm:$0xff]  }
  0x5c   :  { %1985 = vmatprep.subr.bf16.mxu0 %v2133_v48  ;;  %2007 = vmatprep.subr.bf16.mxu1 %v2135_v51  ;;  %v2185_v48 = vld [vmem:[#allocation2 + $0x20] ss:$8 sps:$4 sm:$0xff]   ;;  %v2193_v51 = vld [vmem:[#allocation2 + $0x4] ss:$8 sps:$4 sm:$0xff]  }
  0x5f   :  { %1986 = vmatpush3.bf16.msra.mxu0 %v2134_v49  ;;  %2008 = vmatpush3.bf16.msra.mxu1 %v2136_v54  ;;  %v2190_v49 = vld [vmem:[#allocation2 + $0x14] ss:$8 sps:$4 sm:$0xff]  }
  0x60   :  { %2015 = vmatprep.subr.bf16.mxu0 %v2137_v57  ;;  %2037 = vmatprep.subr.bf16.mxu1 %v2139_v61 }
  0x62   :  { %847 = vmatmul.mubr.bf16.vlgmr.msra.gmra.mxu0 %v396_v56  ;;  %887 = vmatmul.mubr.bf16.vlgmr.msra.gmra.mxu1 %v418_v1  ;;  %v2199_v1 = vld [vmem:[#allocation4 + $0x64] ss:$8 sps:$4 sm:$0xff]  }
  0x63   :  { %2016 = vmatpush3.bf16.msra.mxu0 %v2138_v59  ;;  %2038 = vmatpush3.bf16.msra.mxu1 %v2140_v63  ;;  %v2194_v63 = vld [vmem:[#allocation4 + $0x70] ss:$8 sps:$4 sm:$0xff]  }
  0x64   :  { %2017 = vmatprep.subr.bf16.mxu0 %v2141_v2  ;;  %926 = vmatprep.mubr.bf16.mxu0 %v417_v5  ;;  %v2197_v2 = vld [vmem:[#allocation4 + $0x60] ss:$8 sps:$4 sm:$0xff]   ;;  %v2202_v5 = vld [vmem:[#allocation4 + $0x54] ss:$8 sps:$4 sm:$0xff]  }
  0x65   :  { %2039 = vmatprep.subr.bf16.mxu1 %v2143_v7  ;;  %966 = vmatprep.mubr.bf16.mxu1 %v421_v8 }
  0x67   :  { %2018 = vmatpush3.bf16.msra.mxu0 %v2142_v6  ;;  %2040 = vmatpush3.bf16.msra.mxu1 %v2144_v9  ;;  %v2200_v9 = vld [vmem:[#allocation4 + $0x50] ss:$8 sps:$4 sm:$0xff]  }
  0x68   :  { %2019 = vmatprep.subr.bf16.mxu0 %v2145_v10  ;;  %2041 = vmatprep.subr.bf16.mxu1 %v2147_v12  ;;  %v2205_v10 = vld [vmem:[#allocation4 + $0x44] ss:$8 sps:$4 sm:$0xff]  }
  0x6b   :  { %2020 = vmatpush3.bf16.msra.mxu0 %v2146_v11  ;;  %2042 = vmatpush3.bf16.msra.mxu1 %v2148_v13 }
  0x6c   :  { %2021 = vmatprep.subr.bf16.mxu0 %v2149_v14  ;;  %2043 = vmatprep.subr.bf16.mxu1 %v2151_v16  ;;  %v2208_v16 = vld [vmem:[#allocation4 + $0x34] ss:$8 sps:$4 sm:$0xff]  }
  0x6f   :  { %2022 = vmatpush3.bf16.msra.mxu0 %v2150_v15  ;;  %2044 = vmatpush3.bf16.msra.mxu1 %v2152_v17  ;;  %v2203_v15 = vld [vmem:[#allocation4 + $0x40] ss:$8 sps:$4 sm:$0xff]  }
  0x70   :  { %2023 = vmatprep.subr.bf16.mxu0 %v2153_v18  ;;  %2045 = vmatprep.subr.bf16.mxu1 %v2155_v20  ;;  %v2206_v18 = vld [vmem:[#allocation4 + $0x30] ss:$8 sps:$4 sm:$0xff]   ;;  %v2209_v20 = vld [vmem:[#allocation4 + $0x20] ss:$8 sps:$4 sm:$0xff]  }
  0x73   :  { %2024 = vmatpush3.bf16.msra.mxu0 %v2154_v19  ;;  %2046 = vmatpush3.bf16.msra.mxu1 %v2156_v21  ;;  %v2211_v19 = vld [vmem:[#allocation4 + $0x24] ss:$8 sps:$4 sm:$0xff]   ;;  %v2214_v21 = vld [vmem:[#allocation4 + $0x14] ss:$8 sps:$4 sm:$0xff]  }
  0x74   :  { %2025 = vmatprep.subr.bf16.mxu0 %v2157_v22  ;;  %2047 = vmatprep.subr.bf16.mxu1 %v2159_v24  ;;  %v2212_v22 = vld [vmem:[#allocation4 + $0x10] ss:$8 sps:$4 sm:$0xff]   ;;  %v2723_v24 = vld [vmem:[%s2777_s10] sm:$0xff] }
  0x77   :  { %2026 = vmatpush3.bf16.msra.mxu0 %v2158_v23  ;;  %2048 = vmatpush3.bf16.msra.mxu1 %v2160_v25  ;;  %v2718_v23 = vsub.s32 0, %v2480_v4 }
  0x78   :  { %2027 = vmatprep.subr.bf16.mxu0 %v2161_v26  ;;  %2049 = vmatprep.subr.bf16.mxu1 %v2163_v28 }
  0x79   :  { %v371_v25 = vrot.slane %v2723_v24, %v2718_v23 }
  0x7b   :  { %2028 = vmatpush3.bf16.msra.mxu0 %v2162_v27  ;;  %2050 = vmatpush3.bf16.msra.mxu1 %v2164_v29 }
  0x7c   :  { %2029 = vmatprep.subr.bf16.mxu0 %v2165_v30  ;;  %2051 = vmatprep.subr.bf16.mxu1 %v2167_v32 }
  0x7f   :  { %2030 = vmatpush3.bf16.msra.mxu0 %v2166_v31  ;;  %2052 = vmatpush3.bf16.msra.mxu1 %v2169_v34 }
  0x80   :  { %1080 = vmatprep.subr.bf16.mxu0 %v2172_v38  ;;  %1228 = vmatprep.subr.bf16.mxu1 %v2196_v0  ;;  %v2224_v0 = vld [vmem:[#allocation6 + $0x8] sm:$0xff]  }
  0x82   :  { %927 = vmatmul.mubr.bf16.vlgmr.msra.gmra.mxu0 %v403_v35  ;;  %967 = vmatmul.mubr.bf16.vlgmr.msra.gmra.mxu1 %v419_v36 }
  0x83   :  { %1112 = vmatprep.mubr.bf16.mxu0 %v2393_v3  ;;  %1260 = vmatprep.mubr.bf16.mxu1 %v2393_v3 }
  0x84   :  { %1081 = vmatpush1.bf16.msra.mxu0 %v2170_v37  ;;  %1229 = vmatpush1.bf16.msra.mxu1 %v2194_v63  ;;  %v2223_v63 = vld [vmem:[#allocation6 + $0x10] sm:$0xff]  }
  0x85   :  { %1082 = vmatprep.subr.bf16.mxu0 %v2175_v39  ;;  %1230 = vmatprep.subr.bf16.mxu1 %v2199_v1  ;;  %v2731_v1 = vsub.s32 1, %v2480_v4 }
  0x88   :  { %1083 = vmatpush1.bf16.msra.mxu0 %v2173_v40  ;;  %1231 = vmatpush1.bf16.msra.mxu1 %v2197_v2  ;;  %v995_v2 = vrot.slane %v2723_v24, %v2731_v1 }
  0x89   :  { %1084 = vmatprep.subr.bf16.mxu0 %v2178_v41  ;;  %1232 = vmatprep.subr.bf16.mxu1 %v2202_v5 }
  0x8c   :  { %1085 = vmatpush1.bf16.msra.mxu0 %v2176_v42  ;;  %1233 = vmatpush1.bf16.msra.mxu1 %v2200_v9 }
  0x8d   :  { %1086 = vmatprep.subr.bf16.mxu0 %v2181_v43  ;;  %1234 = vmatprep.subr.bf16.mxu1 %v2205_v10 }
  0x90   :  { %1087 = vmatpush1.bf16.msra.mxu0 %v2179_v44  ;;  %1235 = vmatpush1.bf16.msra.mxu1 %v2203_v15  ;;  %v2217_v44 = vld [vmem:[#allocation4 + $0x4] ss:$8 sps:$4 sm:$0xff]   ;;  %v2252_v15 = vld [vmem:[#allocation7 + $0x74] ss:$8 sps:$4 sm:$0xff]  }
  0x91   :  { %1088 = vmatprep.subr.bf16.mxu0 %v2184_v45  ;;  %1236 = vmatprep.subr.bf16.mxu1 %v2208_v16  ;;  %v2215_v45 = vld [vmem:[#allocation4] ss:$8 sps:$4 sm:$0xff]   ;;  %v2255_v16 = vld [vmem:[#allocation7 + $0x64] ss:$8 sps:$4 sm:$0xff]  }
  0x94   :  { %1089 = vmatpush1.bf16.msra.mxu0 %v2182_v46  ;;  %1237 = vmatpush1.bf16.msra.mxu1 %v2206_v18  ;;  %v1757_v46 = vld [vmem:[%s2771_s4] sm:$0xff]  ;;  %v2258_v18 = vld [vmem:[#allocation7 + $0x54] ss:$8 sps:$4 sm:$0xff]  }
  0x95   :  { %1090 = vmatprep.subr.bf16.mxu0 %v2187_v47  ;;  %1238 = vmatprep.subr.bf16.mxu1 %v2211_v19  ;;  %v2256_v19 = vld [vmem:[#allocation7 + $0x50] ss:$8 sps:$4 sm:$0xff]  }
  0x98   :  { %1091 = vmatpush1.bf16.msra.mxu0 %v2185_v48  ;;  %1239 = vmatpush1.bf16.msra.mxu1 %v2209_v20  ;;  %v2261_v20 = vld [vmem:[#allocation7 + $0x44] ss:$8 sps:$4 sm:$0xff]  }
  0x99   :  { %1092 = vmatprep.subr.bf16.mxu0 %v2190_v49  ;;  %1240 = vmatprep.subr.bf16.mxu1 %v2214_v21  ;;  %v2259_v21 = vld [vmem:[#allocation7 + $0x40] ss:$8 sps:$4 sm:$0xff]  }
  0x9c   :  { %1093 = vmatpush1.bf16.msra.mxu0 %v2188_v50  ;;  %1241 = vmatpush1.bf16.msra.mxu1 %v2212_v22  ;;  %v2264_v22 = vld [vmem:[#allocation7 + $0x34] ss:$8 sps:$4 sm:$0xff]  }
  0x9d   :  { %1094 = vmatprep.subr.bf16.mxu0 %v2193_v51  ;;  %1242 = vmatprep.subr.bf16.mxu1 %v2217_v44  ;;  %v2218_v51 = vld [vmem:[#allocation6 + $0x38] sm:$0xff]   ;;  %v1142_v44 = vsub.s32 2, %v2480_v4 }
  0xa0   :  { %1095 = vmatpush1.bf16.msra.mxu0 %v2191_v52  ;;  %1243 = vmatpush1.bf16.msra.mxu1 %v2215_v45  ;;  %v1143_v45 = vrot.slane %v2723_v24, %v1142_v44 }
  0xa1   :  { %1672 = vmatprep.subr.bf16.mxu1 %v2252_v15 }
 0x102   :  { %v2709_v53 = vpop.f32.mrf.mxu0  ;;  %v2713_v55 = vpop.f32.mrf.mxu1 }
 0x104   :  { %v2711_v54 = vpop.f32.mrf.mxu0  ;;  %v2715_v57 = vpop.f32.mrf.mxu1 }
 0x106   :  { %v178_v56 = vpop.f32.mrf.mxu0  ;;  %v221_v59 = vpop.f32.mrf.mxu1 }
 0x108   :  { %v180_v58 = vpop.f32.mrf.mxu0  ;;  %v223_v61 = vpop.f32.mrf.mxu1 }
 0x109   :  { %v1754_v60 = vadd.f32 %v180_v58, %v178_v56  ;;  %v1779_v62 = vadd.f32 %v223_v61, %v221_v59  ;;  %v2395_v56 = vmov 0.0   ;;  %v2219_v58 = vld [vmem:[#allocation6 + $0x30] sm:$0xff]   ;;  %v2221_v61 = vld [vmem:[#allocation6 + $0x20] sm:$0xff]  }
 0x10a   :  { %2068 = vmatprep.subr.bf16.mxu0 %v2395_v56 }
 0x10b   :  { %1755 = vadd.xlane.f32.xlu0 %v1754_v60  ;;  %v2220_v60 = vld [vmem:[#allocation6 + $0x28] sm:$0xff]  }
 0x10f   :  { %1780 = vadd.xlane.f32.xlu0 %v1779_v62  ;;  %v2222_v62 = vld [vmem:[#allocation6 + $0x18] sm:$0xff]  }
 0x122   :  { %v1987_v6 = vpop.f32.mrf.mxu0  ;;  %v2009_v8 = vpop.f32.mrf.mxu1 }
 0x124   :  { %v1988_v7 = vpop.f32.mrf.mxu0  ;;  %v2010_v12 = vpop.f32.mrf.mxu1 }
 0x125   :  { %v1989_v26 = vadd.f32 %v1988_v7, %v1987_v6  ;;  %v2011_v28 = vadd.f32 %v2010_v12, %v2009_v8  ;;  %v2225_v12 = vld [vmem:[#allocation6] sm:$0xff]  }
 0x126   :  { %v1990_v11 = vpop.f32.mrf.mxu0  ;;  %v2012_v14 = vpop.f32.mrf.mxu1 }
 0x127   :  { %v849_v27 = vadd.f32 %v1989_v26, %v371_v25  ;;  %v2250_v14 = vld [vmem:[#allocation7 + $0x70] ss:$8 sps:$4 sm:$0xff]   ;;  %v2267_v26 = vld [vmem:[#allocation7 + $0x24] ss:$8 sps:$4 sm:$0xff]  }
 0x128   :  { %v1991_v13 = vpop.f32.mrf.mxu0  ;;  %v2013_v17 = vpop.f32.mrf.mxu1  ;;  %v2262_v25 = vld [vmem:[#allocation7 + $0x30] ss:$8 sps:$4 sm:$0xff]  }
 0x129   :  { %v889_v32 = vadd.f32 %v2011_v28, %v849_v27  ;;  %v2228_v13 = vld [vmem:[#allocation7 + $0x174] ss:$8 sps:$4 sm:$0xff]   ;;  %v2253_v17 = vld [vmem:[#allocation7 + $0x60] ss:$8 sps:$4 sm:$0xff]  }
 0x12a   :  { %v2265_v27 = vld [vmem:[#allocation7 + $0x20] ss:$8 sps:$4 sm:$0xff]   ;;  %v2270_v28 = vld [vmem:[#allocation7 + $0x14] ss:$8 sps:$4 sm:$0xff]  }
 0x142   :  { %v2031_v29 = vpop.f32.mrf.mxu0  ;;  %v2053_v31 = vpop.f32.mrf.mxu1 }
 0x144   :  { %v2032_v30 = vpop.f32.mrf.mxu0  ;;  %v2054_v35 = vpop.f32.mrf.mxu1 }
 0x145   :  { %v2033_v33 = vadd.f32 %v2032_v30, %v2031_v29  ;;  %v2055_v37 = vadd.f32 %v2054_v35, %v2053_v31  ;;  %v2268_v29 = vld [vmem:[#allocation7 + $0x10] ss:$8 sps:$4 sm:$0xff]   ;;  %v2273_v30 = vld [vmem:[#allocation7 + $0x4] ss:$8 sps:$4 sm:$0xff]   ;;  %v2271_v31 = vld [vmem:[#allocation7] ss:$8 sps:$4 sm:$0xff]  }
 0x146   :  { %v2034_v34 = vpop.f32.mrf.mxu0  ;;  %v2056_v39 = vpop.f32.mrf.mxu1  ;;  %v2277_v35 = vld [vmem:[#allocation7 + $0xe0] ss:$8 sps:$4 sm:$0xff]  }
 0x147   :  { %v929_v36 = vadd.f32 %v2033_v33, %v889_v32  ;;  %v2276_v32 = vld [vmem:[#allocation7 + $0xf4] ss:$8 sps:$4 sm:$0xff]   ;;  %v2274_v33 = vld [vmem:[#allocation7 + $0xf0] ss:$8 sps:$4 sm:$0xff]   ;;  %v2279_v34 = vld [vmem:[#allocation7 + $0xe4] ss:$8 sps:$4 sm:$0xff]  }
 0x148   :  { %v2035_v38 = vpop.f32.mrf.mxu0  ;;  %v2057_v41 = vpop.f32.mrf.mxu1  ;;  %v2283_v39 = vld [vmem:[#allocation7 + $0xc0] ss:$8 sps:$4 sm:$0xff]  }
 0x149   :  { %v969_v40 = vadd.f32 %v2055_v37, %v929_v36  ;;  %v2282_v36 = vld [vmem:[#allocation7 + $0xd4] ss:$8 sps:$4 sm:$0xff]   ;;  %v2280_v37 = vld [vmem:[#allocation7 + $0xd0] ss:$8 sps:$4 sm:$0xff]   ;;  %v2285_v38 = vld [vmem:[#allocation7 + $0xc4] ss:$8 sps:$4 sm:$0xff]  }
 0x14a   :  { %v2286_v41 = vld [vmem:[#allocation7 + $0xb0] ss:$8 sps:$4 sm:$0xff]  }
 0x14b   :  { %v974_v42 = vmax.f32 %v969_v40, 0.0  ;;  %v2288_v40 = vld [vmem:[#allocation7 + $0xb4] ss:$8 sps:$4 sm:$0xff]  }
 0x14d   :  { %v975_v43 = vpack.c.bf16 %v974_v42, %v974_v42  ;;  %v2291_v42 = vld [vmem:[#allocation7 + $0xa4] ss:$8 sps:$4 sm:$0xff]  }
 0x14f   :  { %1113 = vmatmul.mubr.bf16.vlgmr.msra.gmra.mxu0 %v975_v43  ;;  %v2289_v43 = vld [vmem:[#allocation7 + $0xa0] ss:$8 sps:$4 sm:$0xff]  }
 0x150   :  { %2069 = vmatpush3.bf16.msra.mxu0 %v2218_v51  ;;  %2084 = vmatprep.mubr.msk.bf16.mxu0 %vm2396_vm2, %v2395_v56  ;;  %v2226_v51 = vld [vmem:[#allocation7 + $0x170] ss:$8 sps:$4 sm:$0xff]  }
 0x151   :  { %2070 = vmatprep.subr.bf16.mxu0 %v2395_v56 }
 0x154   :  { %2071 = vmatpush3.bf16.msra.mxu0 %v2219_v58 }
 0x155   :  { %2072 = vmatprep.subr.bf16.mxu0 %v2395_v56 }
 0x158   :  { %2073 = vmatpush3.bf16.msra.mxu0 %v2220_v60  ;;  %v2234_v60 = vld [vmem:[#allocation7 + $0x154] ss:$8 sps:$4 sm:$0xff]  }
 0x159   :  { %2074 = vmatprep.subr.bf16.mxu0 %v2395_v56 }
 0x15c   :  { %2075 = vmatpush3.bf16.msra.mxu0 %v2221_v61  ;;  %v2232_v61 = vld [vmem:[#allocation7 + $0x150] ss:$8 sps:$4 sm:$0xff]  }
 0x15d   :  { %2076 = vmatprep.subr.bf16.mxu0 %v2395_v56 }
 0x160   :  { %2077 = vmatpush3.bf16.msra.mxu0 %v2222_v62  ;;  %v2237_v62 = vld [vmem:[#allocation7 + $0x144] ss:$8 sps:$4 sm:$0xff]  }
 0x161   :  { %2078 = vmatprep.subr.bf16.mxu0 %v2395_v56 }
 0x164   :  { %2079 = vmatpush3.bf16.msra.mxu0 %v2223_v63  ;;  %v2235_v63 = vld [vmem:[#allocation7 + $0x140] ss:$8 sps:$4 sm:$0xff]  }
 0x165   :  { %2080 = vmatprep.subr.bf16.mxu0 %v2395_v56 }
 0x168   :  { %2081 = vmatpush3.bf16.msra.mxu0 %v2224_v0  ;;  %v2240_v0 = vld [vmem:[#allocation7 + $0x134] ss:$8 sps:$4 sm:$0xff]  }
 0x169   :  { %2082 = vmatprep.subr.bf16.mxu0 %v2395_v56  ;;  %v2231_v56 = vld [vmem:[#allocation7 + $0x164] ss:$8 sps:$4 sm:$0xff]  }
 0x16c   :  { %2083 = vmatpush3.bf16.msra.mxu0 %v2225_v12  ;;  %v2249_v12 = vld [vmem:[#allocation7 + $0x104] ss:$8 sps:$4 sm:$0xff]  }
 0x16d   :  { %1713 = vmatprep.subr.bf16.mxu0 %v2228_v13  ;;  %v2247_v13 = vld [vmem:[#allocation7 + $0x100] ss:$8 sps:$4 sm:$0xff]  }
 0x194   :  { %v1756_v47 = vpop.xlane.xlu0 %1755 }
 0x195   :  { %v1758_v48 = vadd.f32 %v1757_v46, %v1756_v47 }
 0x197   :  { %v1759_v49 = vmax.f32 %v1758_v48, 0.0 }
 0x198   :  { %v1781_v50 = vpop.xlane.xlu0 %1780 }
 0x199   :  { %v1783_v52 = vadd.f32 %v1781_v50, %v1757_v46  ;;  %1772 = vperm.xlu1 %2101, %v1759_v49  }
 0x19b   :  { %v1784_v59 = vmax.f32 %v1783_v52, 0.0 }
 0x19d   :  { %1797 = vperm.xlu0 %2102, %v1784_v59   ;;  %v2229_v59 = vld [vmem:[#allocation7 + $0x160] ss:$8 sps:$4 sm:$0xff]  }
 0x20f   :  { %v1114_v5 = vpop.f32.mrf.mxu0 }
 0x210   :  { %v1115_v6 = vadd.f32 %v1114_v5, %v995_v2  ;;  %v2238_v2 = vld [vmem:[#allocation7 + $0x130] ss:$8 sps:$4 sm:$0xff]   ;;  %v2243_v5 = vld [vmem:[#allocation7 + $0x124] ss:$8 sps:$4 sm:$0xff]  }
 0x211   :  { %v2735_v7 = vpop.f32.mrf.mxu0 }
 0x212   :  { %v1121_v8 = vmax.f32 %v1115_v6, 0.0  ;;  %v97_v6 = vld [vmem:[%s2777_s10 + $0x8] sm:$0xff] }
 0x213   :  { %v1118_v9 = vpop.f32.mrf.mxu0 }
 0x214   :  { %v1123_v10 = vpack.c.bf16 %v1121_v8, %v1121_v8  ;;  %v999_v8 = vrot.slane %v97_v6, %v2731_v1  ;;  %v2246_v9 = vld [vmem:[#allocation7 + $0x114] ss:$8 sps:$4 sm:$0xff]  }
 0x215   :  { %v1119_v11 = vpop.f32.mrf.mxu0 }
 0x216   :  { %1261 = vmatmul.mubr.bf16.vlgmr.msra.gmra.mxu1 %v1123_v10  ;;  %v2244_v10 = vld [vmem:[#allocation7 + $0x110] ss:$8 sps:$4 sm:$0xff]   ;;  %v1117_v11 = vadd.f32 %v2735_v7, %v999_v8  ;;  %v1147_v7 = vrot.slane %v97_v6, %v1142_v44 }
 0x217   :  { %1673 = vmatpush1.bf16.msra.mxu1 %v2250_v14 }
 0x218   :  { %1674 = vmatprep.subr.bf16.mxu1 %v2255_v16  ;;  %v1122_v14 = vmax.f32 %v1117_v11, 0.0  ;;  %v2294_v16 = vld [vmem:[#allocation7 + $0x94] ss:$8 sps:$4 sm:$0xff]  }
 0x21a   :  { %v1383_v15 = vpack.c.bf16 %v1122_v14, %v1122_v14 }
 0x21b   :  { %1675 = vmatpush1.bf16.msra.mxu1 %v2253_v17  ;;  %v2292_v17 = vld [vmem:[#allocation7 + $0x90] ss:$8 sps:$4 sm:$0xff]  }
 0x21c   :  { %1676 = vmatprep.subr.bf16.mxu1 %v2258_v18  ;;  %v2297_v18 = vld [vmem:[#allocation7 + $0x84] ss:$8 sps:$4 sm:$0xff]  }
 0x21f   :  { %1677 = vmatpush1.bf16.msra.mxu1 %v2256_v19  ;;  %v2295_v19 = vld [vmem:[#allocation7 + $0x80] ss:$8 sps:$4 sm:$0xff]  }
 0x220   :  { %1678 = vmatprep.subr.bf16.mxu1 %v2261_v20  ;;  %v1290_v20 = vsub.s32 3, %v2480_v4  ;;  %v230_v4 = vpop.permute.xlu1 %229 }
 0x223   :  { %1679 = vmatpush1.bf16.msra.mxu1 %v2259_v21  ;;  %v1291_v21 = vrot.slane %v2723_v24, %v1290_v20  ;;  %v234_v24 = vadd.f32 %v230_v4, %v2713_v55 }
 0x224   :  { %1680 = vmatprep.subr.bf16.mxu1 %v2264_v22 }
 0x227   :  { %1681 = vmatpush1.bf16.msra.mxu1 %v2262_v25 }
 0x228   :  { %1682 = vmatprep.subr.bf16.mxu1 %v2267_v26 }
 0x22b   :  { %1683 = vmatpush1.bf16.msra.mxu1 %v2265_v27 }
 0x22c   :  { %1684 = vmatprep.subr.bf16.mxu1 %v2270_v28 }
 0x22f   :  { %1685 = vmatpush1.bf16.msra.mxu1 %v2268_v29 }
 0x230   :  { %1686 = vmatprep.subr.bf16.mxu1 %v2273_v30 }
 0x233   :  { %1687 = vmatpush1.bf16.msra.mxu1 %v2271_v31 }
 0x234   :  { %1688 = vmatprep.subr.bf16.mxu1 %v2276_v32 }
 0x237   :  { %1689 = vmatpush2.bf16.msra.mxu1 %v2274_v33 }
 0x238   :  { %1690 = vmatprep.subr.bf16.mxu1 %v2279_v34 }
 0x23b   :  { %1691 = vmatpush2.bf16.msra.mxu1 %v2277_v35 }
 0x23c   :  { %1692 = vmatprep.subr.bf16.mxu1 %v2282_v36 }
 0x23f   :  { %1693 = vmatpush2.bf16.msra.mxu1 %v2280_v37 }
 0x240   :  { %1694 = vmatprep.subr.bf16.mxu1 %v2285_v38  ;;  %v232_v38 = vadd.f32 %v230_v4, %v2709_v53  ;;  %v1773_v53 = vpop.permute.xlu1 %1772 }
 0x243   :  { %1695 = vmatpush2.bf16.msra.mxu1 %v2283_v39  ;;  %v233_v39 = vadd.f32 %v230_v4, %v2711_v54 }
 0x244   :  { %1696 = vmatprep.subr.bf16.mxu1 %v2288_v40  ;;  %v235_v40 = vadd.f32 %v230_v4, %v2715_v57 }
 0x247   :  { %1697 = vmatpush2.bf16.msra.mxu1 %v2286_v41 }
 0x248   :  { %1698 = vmatprep.subr.bf16.mxu1 %v2291_v42 }
 0x24b   :  { %1699 = vmatpush2.bf16.msra.mxu1 %v2289_v43  ;;  %v236_v43 = vmax.f32 %v232_v38, 0.0 }
 0x24c   :  { %1700 = vmatprep.subr.bf16.mxu1 %v2294_v16 }
 0x24f   :  { %1701 = vmatpush2.bf16.msra.mxu1 %v2292_v17 }
 0x250   :  { %1702 = vmatprep.subr.bf16.mxu1 %v2297_v18 }
 0x253   :  { %1703 = vmatpush2.bf16.msra.mxu1 %v2295_v19 }
 0x2d6   :  { %v1262_v46 = vpop.f32.mrf.mxu1 }
 0x2d7   :  { %v1263_v47 = vadd.f32 %v1262_v46, %v1143_v45  ;;  %v238_v45 = vmax.f32 %v234_v24, 0.0 }
 0x2d8   :  { %v1264_v48 = vpop.f32.mrf.mxu1 }
 0x2d9   :  { %v1269_v49 = vmax.f32 %v1263_v47, 0.0  ;;  %v1265_v22 = vadd.f32 %v1264_v48, %v1147_v7 }
 0x2da   :  { %v1266_v50 = vpop.f32.mrf.mxu1 }
 0x2db   :  { %v1271_v52 = vpack.c.bf16 %v1269_v49, %v1269_v49  ;;  %v1270_v27 = vmax.f32 %v1265_v22, 0.0  ;;  %v237_v49 = vmax.f32 %v233_v39, 0.0  ;;  %v239_v50 = vmax.f32 %v235_v40, 0.0 }
 0x2dc   :  { %v1267_v58 = vpop.f32.mrf.mxu1 }
 0x2dd   :  { %2085 = vmatmul.mubr.bf16.vlgmr.msra.gmra.mxu0 %v1271_v52  ;;  %v1381_v32 = vpack.c.bf16 %v1270_v27, %v1270_v27 }
 0x2de   :  { %1714 = vmatpush1.bf16.msra.mxu0 %v2226_v51  ;;  %1745 = vmatprep.mubr.bf16.mxu0 %v2393_v3  ;;  %v2241_v3 = vld [vmem:[#allocation7 + $0x120] ss:$8 sps:$4 sm:$0xff]  }
 0x2df   :  { %1715 = vmatprep.subr.bf16.mxu0 %v2231_v56  ;;  %v1798_v56 = vpop.permute.xlu0 %1797 }
 0x2e2   :  { %1716 = vmatpush1.bf16.msra.mxu0 %v2229_v59 }
 0x2e3   :  { %1717 = vmatprep.subr.bf16.mxu0 %v2234_v60 }
 0x2e6   :  { %1718 = vmatpush1.bf16.msra.mxu0 %v2232_v61 }
 0x2e7   :  { %1719 = vmatprep.subr.bf16.mxu0 %v2237_v62 }
 0x2ea   :  { %1720 = vmatpush1.bf16.msra.mxu0 %v2235_v63 }
 0x2eb   :  { %1721 = vmatprep.subr.bf16.mxu0 %v2240_v0 }
 0x2ee   :  { %1722 = vmatpush1.bf16.msra.mxu0 %v2238_v2 }
 0x2ef   :  { %1723 = vmatprep.subr.bf16.mxu0 %v2243_v5 }
 0x2f2   :  { %1724 = vmatpush1.bf16.msra.mxu0 %v2241_v3 }
 0x2f3   :  { %1725 = vmatprep.subr.bf16.mxu0 %v2246_v9 }
 0x2f6   :  { %1726 = vmatpush1.bf16.msra.mxu0 %v2244_v10 }
 0x2f7   :  { %1727 = vmatprep.subr.bf16.mxu0 %v2249_v12 }
 0x2fa   :  { %1728 = vmatpush1.bf16.msra.mxu0 %v2247_v13 }
 0x2fd   :  { %1746 = vmatmul.mubr.bf16.vlgmr.msra.gmra.mxu0 %v1383_v15 }
 0x39d   :  { %v1374_v25 = vpop.f32.mrf.mxu0 }
 0x39e   :  { %v1375_v26 = vadd.f32 %v1374_v25, %v1291_v21 }
 0x39f   :  { %v2086_v28 = vpop.f32.mrf.mxu0 }
 0x3a0   :  { %v1380_v29 = vmax.f32 %v1375_v26, 0.0 }
 0x3a1   :  { %v1377_v30 = vpop.f32.mrf.mxu0 }
 0x3a2   :  { %v1382_v31 = vpack.c.bf16 %v1380_v29, %v1380_v29 }
 0x3a3   :  { %v2087_v33 = vpop.f32.mrf.mxu0 }
 0x3a4   :  { %1704 = vmatprep.mubr.bf16.mxu1 %v1382_v31 }
 0x3a5   :  { %1705 = vmatmul.mubr.bf16.vlgmr.msra.gmra.mxu1 %v1381_v32 }
 0x3bd   :  { %v1747_v34 = vpop.f32.mrf.mxu0 }
 0x3bf   :  { %v1749_v35 = vpop.f32.mrf.mxu0 }
 0x3c1   :  { %v1751_v36 = vpop.f32.mrf.mxu0 }
 0x3c3   :  { %v1752_v37 = vpop.f32.mrf.mxu0 }
 0x465   :  { %v1706_v41 = vpop.f32.mrf.mxu1 }
 0x466   :  { %v1748_v42 = vadd.f32 %v1747_v34, %v1706_v41 }
 0x467   :  { %v1708_v44 = vpop.f32.mrf.mxu1 }
 0x468   :  { %v1763_v46 = vrot.slane %v1748_v42, %v2718_v23  ;;  %v1788_v47 = vrot.slane %v1748_v42, %v2731_v1  ;;  %v1750_v48 = vadd.f32 %v1749_v35, %v1708_v44 }
 0x469   :  { %v1710_v51 = vpop.f32.mrf.mxu1 }
 0x46a   :  { %v1768_v52 = vmul.f32 %v1763_v46, %v236_v43  ;;  %v1793_v55 = vmul.f32 %v1788_v47, %v238_v45  ;;  %v1767_v54 = vrot.slane %v1750_v48, %v2718_v23  ;;  %v1792_v57 = vrot.slane %v1750_v48, %v2731_v1 }
 0x46b   :  { %v1711_v58 = vpop.f32.mrf.mxu1 }
 0x46c   :  { %v1775_v59 = vadd.f32 %v1773_v53, %v1768_v52  ;;  %v1800_v60 = vadd.f32 %v1798_v56, %v1793_v55  ;;  %v1769_v61 = vmul.f32 %v1767_v54, %v237_v49  ;;  %v1794_v62 = vmul.f32 %v1792_v57, %v239_v50 }
 0x46e   :  { %1777 = vst [vmem:[%s2778_s11] sm:$0xff] %v1775_v59  ;;  %1969 = vst [vmem:[%s2778_s11 + $0x10] sm:$0xff] %v1800_v60  ;;  %v1776_v63 = vadd.f32 %v1773_v53, %v1769_v61  ;;  %v1801_v0 = vadd.f32 %v1798_v56, %v1794_v62 }
 0x470   :  { %1778 = vst [vmem:[%s2778_s11 + $0x8] sm:$0xff] %v1776_v63  ;;  %1970 = vst [vmem:[%s2778_s11 + $0x18] sm:$0xff] %v1801_v0 }
 0x471   :  { %1809 = vsyncpa [#allocation3], 1 }
 0x472   :  { %1810 = vsyncpa [#allocation5], 1 }
 0x473   :  { %1811 = vsyncpa [#allocation8], 1 }

</bundles_post_ra>
